<compile_context>
chip_gen: v7x
topology: tpu7x:2x2x1
jax: 0.10.0
libtpu: 0.0.40
codegen_flags: <defaults>
</compile_context>

<pallas_src>
import math

import jax
import jax.numpy as jnp
from jax.experimental import pallas as pl
from jax.experimental.pallas import tpu as pltpu


def dgn_kernel(x_ref, s_ref,
               we_ref, be_ref,      # encoder:  (Din, H) bf16, (1, H) f32
               wv_ref, bv_ref,      # fcv:      (H, H)  bf16, (1, H) f32
               wot_ref, bo_ref,     # q_net^T:  (A, H)  bf16, (A, 1) f32
               qt_ref):             # out:      (A, TB*N) f32, lane-dense
    f32 = jnp.float32
    TB, N, _ = s_ref.shape
    M = x_ref.shape[0]               # M = TB * N
    H = we_ref.shape[1]

    # ---- encoder + fcv on the flattened (M, *) slab (bf16 in, f32 acc) ----
    h1 = jnp.maximum(
        jnp.dot(x_ref[...], we_ref[...], preferred_element_type=f32)
        + be_ref[...], 0.0)                                      # (M, H) f32
    v = jnp.maximum(
        jnp.dot(h1.astype(wv_ref.dtype), wv_ref[...],
                preferred_element_type=f32) + bv_ref[...], 0.0)  # (M, H) f32

    # ---- softmax over the pre-masked scores (mask fill done in wrapper) ---
    s = s_ref[...]                                               # (TB, N, N)
    m = jnp.max(s, axis=-1, keepdims=True)
    e = jnp.exp(s - m)
    att = e * pl.reciprocal(jnp.sum(e, axis=-1, keepdims=True), approx=True)

    # ---- att @ v: contraction depth j = N is tiny -> unrolled VPU MAC -----
    v3 = v.reshape(TB, N, H)
    h2 = att[:, :, 0:1] * v3[:, 0:1, :]                          # (TB, N, H)
    for j in range(1, N):                                        # static unroll
        h2 = h2 + att[:, :, j:j + 1] * v3[:, j:j + 1, :]

    # ---- q_net, emitted feature-major (A, M) so the store is lane-dense ---
    h2f = h2.reshape(M, H).astype(wot_ref.dtype)
    qt = jnp.dot(wot_ref[...], h2f.T, preferred_element_type=f32) + bo_ref[...]
    qt_ref[...] = qt


def _pick_tb(B, N, block_b):
    """Batch-tile size: big slabs, lane-dense q tiling, >=2 steps for v7x."""
    if block_b is None:
        block_b = max(1, 2048 // max(N, 1))      # target ~2048 rows per step
    TB = max(1, min(block_b, B))
    # v7x has 2 TensorCores: prefer >= 2 grid steps when halving still keeps a
    # reasonably large tile.  No-op on v5e/v6e (single TC).
    if TB == B and (B // 2) * N >= 1024:
        TB = pl.cdiv(B, 2)
    # The lane-dense (A, TB*N) q tile needs TB*N % 128 == 0 unless one block
    # covers the whole (padded) batch.
    if TB < B and (TB * N) % 128 != 0:
        g = 128 // math.gcd(N, 128)
        TB = (TB // g) * g
        if TB == 0:
            TB = B                               # fall back to one full tile
    return TB


def dgn_forward(x, mask, params, *, block_b=None, matmul_dtype=jnp.bfloat16):
    B, N, Din = x.shape
    H = params["we"].shape[1]
    A = params["wo"].shape[1]

    # a_w == masked scores: pure function of the mask, computed as a fused XLA
    # elementwise op here (no kernel output stream).  The kernel softmaxes the
    # same tensor, so it is passed in instead of the raw mask.
    scores = jnp.where(mask != 0.0, mask, jnp.full_like(mask, -900000.0))

    TB = _pick_tb(B, N, block_b)
    B_pad = pl.cdiv(B, TB) * TB

    # Wrapper-side flatten (free XLA reshape) -> kernel sees a (rows, feat) slab.
    x2d = x.reshape(B * N, Din).astype(matmul_dtype)
    scores_in = scores
    if B_pad != B:
        x2d = jnp.pad(x2d, ((0, (B_pad - B) * N), (0, 0)))
        scores_in = jnp.pad(scores, ((0, B_pad - B), (0, 0), (0, 0)))

    we = params["we"].astype(matmul_dtype)
    wv = params["wv"].astype(matmul_dtype)
    wot = params["wo"].T.astype(matmul_dtype)                  # (A, H)
    be = params["be"].astype(jnp.float32)
    bv = params["bv"].astype(jnp.float32)
    bo = params["bo"].reshape(A, 1).astype(jnp.float32)

    def full_spec(shape):
        nd = len(shape)
        return pl.BlockSpec(shape, lambda b, _nd=nd: (0,) * _nd)

    in_specs = [
        pl.BlockSpec((TB * N, Din), lambda b: (b, 0)),         # x rows
        pl.BlockSpec((TB, N, N), lambda b: (b, 0, 0)),         # masked scores
        full_spec((Din, H)), full_spec((1, H)),                # encoder
        full_spec((H, H)), full_spec((1, H)),                  # fcv
        full_spec((A, H)), full_spec((A, 1)),                  # q_net (transposed)
    ]
    out_specs = pl.BlockSpec((A, TB * N), lambda b: (0, b))    # lane-dense q^T
    out_shape = jax.ShapeDtypeStruct((A, B_pad * N), jnp.float32)

    qt = pl.pallas_call(
        dgn_kernel,
        out_shape=out_shape,
        grid_spec=pltpu.PrefetchScalarGridSpec(
            num_scalar_prefetch=0,
            grid=(B_pad // TB,),
            in_specs=in_specs,
            out_specs=out_specs,
        ),
        compiler_params=pltpu.CompilerParams(
            dimension_semantics=("parallel",),   # megacore sharding on v7x
        ),
    )(x2d, scores_in, we, be, wv, bv, wot, bo)

    q = qt.T.reshape(B_pad, N, A)[:B]
    return q, scores


def init_params(key, num_inputs, hidden_dim, num_actions):
    ks = jax.random.split(key, 6)
    s = 0.1
    return {
        "we": s * jax.random.normal(ks[0], (num_inputs, hidden_dim), jnp.float32),
        "be": s * jax.random.normal(ks[1], (1, hidden_dim), jnp.float32),
        "wv": s * jax.random.normal(ks[2], (hidden_dim, hidden_dim), jnp.float32),
        "bv": s * jax.random.normal(ks[3], (1, hidden_dim), jnp.float32),
        "wo": s * jax.random.normal(ks[4], (hidden_dim, num_actions), jnp.float32),
        "bo": s * jax.random.normal(ks[5], (1, num_actions), jnp.float32),
    }


def dgn_reference(x, mask, params):
    h1 = jax.nn.relu(x @ params["we"] + params["be"])
    v = jax.nn.relu(h1 @ params["wv"] + params["bv"])
    h = jnp.where(mask != 0.0, mask, -900000.0)
    att = jax.nn.softmax(h, axis=-1)
    out = jnp.einsum("bij,bjh->bih", att, v)
    q = out @ params["wo"] + params["bo"]
    return q, h


if __name__ == "__main__":
    B, N = 2, 8                  # batch, n_agent
    num_inputs, hidden_dim, num_actions = 32, 32, 4

    key = jax.random.PRNGKey(0)
    kx, km, kp = jax.random.split(key, 3)

    x = jax.random.normal(kx, (B, N, num_inputs), jnp.float32)
    # binary adjacency mask with self-connections (as in DGN usage)
    mask = (jax.random.uniform(km, (B, N, N)) > 0.5).astype(jnp.float32)
    mask = jnp.maximum(mask, jnp.eye(N, dtype=jnp.float32)[None, :, :])

    params = init_params(kp, num_inputs, hidden_dim, num_actions)

    q, a_w = dgn_forward(x, mask, params)
    jax.block_until_ready((q, a_w))

    assert q.shape == (B, N, num_actions)
    assert a_w.shape == (B, N, N)

    # Loose check vs pure-JAX reference (bf16 matmuls + approx reciprocal).
    q_ref, aw_ref = dgn_reference(x, mask, params)
    assert jnp.allclose(a_w, aw_ref), "a_w mismatch"
    assert jnp.allclose(q, q_ref, atol=3e-2, rtol=5e-2), "q mismatch"
    print("KERNEL_OK")
</pallas_src>

<mosaic_0001>
module attributes {stable_mosaic.version = 11 : i64} {
  func.func @dgn_kernel(%arg0: i32, %arg1: memref<16x32xbf16, #tpu.memory_space<vmem>>, %arg2: memref<2x8x8xf32, #tpu.memory_space<vmem>>, %arg3: memref<32x32xbf16, #tpu.memory_space<vmem>>, %arg4: memref<1x32xf32, #tpu.memory_space<vmem>>, %arg5: memref<32x32xbf16, #tpu.memory_space<vmem>>, %arg6: memref<1x32xf32, #tpu.memory_space<vmem>>, %arg7: memref<4x32xbf16, #tpu.memory_space<vmem>>, %arg8: memref<4x1xf32, #tpu.memory_space<vmem>>, %arg9: memref<4x16xf32, #tpu.memory_space<vmem>>) attributes {dimension_semantics = [#tpu.dimension_semantics<parallel>], iteration_bounds = array<i64: 1>, scalar_prefetch = 0 : i64, scratch_operands = 0 : i64, tpu.core_type = #tpu.core_type<tc>, window_params = [{transform_indices = @transform_0, window_bounds = array<i64: 16, 32>}, {transform_indices = @transform_1, window_bounds = array<i64: 2, 8, 8>}, {pipeline_mode = #tpu.pipeline_mode<synchronous>, transform_indices = @transform_2, window_bounds = array<i64: 32, 32>}, {pipeline_mode = #tpu.pipeline_mode<synchronous>, transform_indices = @transform_3, window_bounds = array<i64: 1, 32>}, {pipeline_mode = #tpu.pipeline_mode<synchronous>, transform_indices = @transform_4, window_bounds = array<i64: 32, 32>}, {pipeline_mode = #tpu.pipeline_mode<synchronous>, transform_indices = @transform_5, window_bounds = array<i64: 1, 32>}, {pipeline_mode = #tpu.pipeline_mode<synchronous>, transform_indices = @transform_6, window_bounds = array<i64: 4, 32>}, {pipeline_mode = #tpu.pipeline_mode<synchronous>, transform_indices = @transform_7, window_bounds = array<i64: 4, 1>}, {transform_indices = @transform_8, window_bounds = array<i64: 4, 16>}]} {
    %c0 = arith.constant 0 : index
    %c0_0 = arith.constant 0 : index
    %0 = vector.load %arg1[%c0, %c0_0] : memref<16x32xbf16, #tpu.memory_space<vmem>>, vector<16x32xbf16>
    %c0_1 = arith.constant 0 : index
    %c0_2 = arith.constant 0 : index
    %1 = vector.load %arg3[%c0_1, %c0_2] : memref<32x32xbf16, #tpu.memory_space<vmem>>, vector<32x32xbf16>
    %cst = arith.constant dense<0.000000e+00> : vector<16x32xf32>
    %2 = tpu.matmul %0, %1, %cst {dimension_numbers = #tpu.dot_dimension_numbers<[1], [0], [0], [1], [0, 0, 1, 1], [], []>} : vector<16x32xbf16>, vector<32x32xbf16>, vector<16x32xf32> -> vector<16x32xf32>
    %c0_3 = arith.constant 0 : index
    %c0_4 = arith.constant 0 : index
    %3 = vector.load %arg4[%c0_3, %c0_4] : memref<1x32xf32, #tpu.memory_space<vmem>>, vector<1x32xf32>
    %4 = vector.broadcast %3 : vector<1x32xf32> to vector<16x32xf32>
    %5 = arith.addf %2, %4 : vector<16x32xf32>
    %cst_5 = arith.constant 0.000000e+00 : f32
    %6 = vector.broadcast %cst_5 : f32 to vector<16x32xf32>
    %7 = arith.maximumf %5, %6 : vector<16x32xf32>
    %8 = arith.truncf %7 : vector<16x32xf32> to vector<16x32xbf16>
    %c0_6 = arith.constant 0 : index
    %c0_7 = arith.constant 0 : index
    %9 = vector.load %arg5[%c0_6, %c0_7] : memref<32x32xbf16, #tpu.memory_space<vmem>>, vector<32x32xbf16>
    %cst_8 = arith.constant dense<0.000000e+00> : vector<16x32xf32>
    %10 = tpu.matmul %8, %9, %cst_8 {dimension_numbers = #tpu.dot_dimension_numbers<[1], [0], [0], [1], [0, 0, 1, 1], [], []>} : vector<16x32xbf16>, vector<32x32xbf16>, vector<16x32xf32> -> vector<16x32xf32>
    %c0_9 = arith.constant 0 : index
    %c0_10 = arith.constant 0 : index
    %11 = vector.load %arg6[%c0_9, %c0_10] : memref<1x32xf32, #tpu.memory_space<vmem>>, vector<1x32xf32>
    %12 = vector.broadcast %11 : vector<1x32xf32> to vector<16x32xf32>
    %13 = arith.addf %10, %12 : vector<16x32xf32>
    %cst_11 = arith.constant 0.000000e+00 : f32
    %14 = vector.broadcast %cst_11 : f32 to vector<16x32xf32>
    %15 = arith.maximumf %13, %14 : vector<16x32xf32>
    %c0_12 = arith.constant 0 : index
    %c0_13 = arith.constant 0 : index
    %c0_14 = arith.constant 0 : index
    %16 = vector.load %arg2[%c0_12, %c0_13, %c0_14] : memref<2x8x8xf32, #tpu.memory_space<vmem>>, vector<2x8x8xf32>
    %cst_15 = arith.constant dense<0xFF800000> : vector<2x8xf32>
    %17 = vector.multi_reduction <maximumf>, %16, %cst_15 [2] : vector<2x8x8xf32> to vector<2x8xf32>
    %18 = vector.shape_cast %17 : vector<2x8xf32> to vector<2x8x1xf32>
    %19 = vector.broadcast %18 : vector<2x8x1xf32> to vector<2x8x8xf32>
    %20 = arith.subf %16, %19 : vector<2x8x8xf32>
    %21 = math.exp %20 : vector<2x8x8xf32>
    %cst_16 = arith.constant dense<0.000000e+00> : vector<2x8xf32>
    %22 = vector.multi_reduction <add>, %21, %cst_16 [2] : vector<2x8x8xf32> to vector<2x8xf32>
    %23 = vector.shape_cast %22 : vector<2x8xf32> to vector<2x8x1xf32>
    %24 = tpu.reciprocal %23 {approx = true} : vector<2x8x1xf32> -> vector<2x8x1xf32>
    %25 = vector.broadcast %24 : vector<2x8x1xf32> to vector<2x8x8xf32>
    %26 = arith.mulf %21, %25 : vector<2x8x8xf32>
    %27 = vector.shape_cast %15 : vector<16x32xf32> to vector<2x8x32xf32>
    %28 = vector.extract_strided_slice %26 {offsets = [0, 0, 0], sizes = [2, 8, 1], strides = [1, 1, 1]} : vector<2x8x8xf32> to vector<2x8x1xf32>
    %29 = vector.extract_strided_slice %27 {offsets = [0, 0, 0], sizes = [2, 1, 32], strides = [1, 1, 1]} : vector<2x8x32xf32> to vector<2x1x32xf32>
    %30 = vector.broadcast %28 : vector<2x8x1xf32> to vector<2x8x32xf32>
    %31 = vector.broadcast %29 : vector<2x1x32xf32> to vector<2x8x32xf32>
    %32 = arith.mulf %30, %31 : vector<2x8x32xf32>
    %33 = vector.extract_strided_slice %26 {offsets = [0, 0, 1], sizes = [2, 8, 1], strides = [1, 1, 1]} : vector<2x8x8xf32> to vector<2x8x1xf32>
    %34 = vector.extract_strided_slice %27 {offsets = [0, 1, 0], sizes = [2, 1, 32], strides = [1, 1, 1]} : vector<2x8x32xf32> to vector<2x1x32xf32>
    %35 = vector.broadcast %33 : vector<2x8x1xf32> to vector<2x8x32xf32>
    %36 = vector.broadcast %34 : vector<2x1x32xf32> to vector<2x8x32xf32>
    %37 = arith.mulf %35, %36 : vector<2x8x32xf32>
    %38 = arith.addf %32, %37 : vector<2x8x32xf32>
    %39 = vector.extract_strided_slice %26 {offsets = [0, 0, 2], sizes = [2, 8, 1], strides = [1, 1, 1]} : vector<2x8x8xf32> to vector<2x8x1xf32>
    %40 = vector.extract_strided_slice %27 {offsets = [0, 2, 0], sizes = [2, 1, 32], strides = [1, 1, 1]} : vector<2x8x32xf32> to vector<2x1x32xf32>
    %41 = vector.broadcast %39 : vector<2x8x1xf32> to vector<2x8x32xf32>
    %42 = vector.broadcast %40 : vector<2x1x32xf32> to vector<2x8x32xf32>
    %43 = arith.mulf %41, %42 : vector<2x8x32xf32>
    %44 = arith.addf %38, %43 : vector<2x8x32xf32>
    %45 = vector.extract_strided_slice %26 {offsets = [0, 0, 3], sizes = [2, 8, 1], strides = [1, 1, 1]} : vector<2x8x8xf32> to vector<2x8x1xf32>
    %46 = vector.extract_strided_slice %27 {offsets = [0, 3, 0], sizes = [2, 1, 32], strides = [1, 1, 1]} : vector<2x8x32xf32> to vector<2x1x32xf32>
    %47 = vector.broadcast %45 : vector<2x8x1xf32> to vector<2x8x32xf32>
    %48 = vector.broadcast %46 : vector<2x1x32xf32> to vector<2x8x32xf32>
    %49 = arith.mulf %47, %48 : vector<2x8x32xf32>
    %50 = arith.addf %44, %49 : vector<2x8x32xf32>
    %51 = vector.extract_strided_slice %26 {offsets = [0, 0, 4], sizes = [2, 8, 1], strides = [1, 1, 1]} : vector<2x8x8xf32> to vector<2x8x1xf32>
    %52 = vector.extract_strided_slice %27 {offsets = [0, 4, 0], sizes = [2, 1, 32], strides = [1, 1, 1]} : vector<2x8x32xf32> to vector<2x1x32xf32>
    %53 = vector.broadcast %51 : vector<2x8x1xf32> to vector<2x8x32xf32>
    %54 = vector.broadcast %52 : vector<2x1x32xf32> to vector<2x8x32xf32>
    %55 = arith.mulf %53, %54 : vector<2x8x32xf32>
    %56 = arith.addf %50, %55 : vector<2x8x32xf32>
    %57 = vector.extract_strided_slice %26 {offsets = [0, 0, 5], sizes = [2, 8, 1], strides = [1, 1, 1]} : vector<2x8x8xf32> to vector<2x8x1xf32>
    %58 = vector.extract_strided_slice %27 {offsets = [0, 5, 0], sizes = [2, 1, 32], strides = [1, 1, 1]} : vector<2x8x32xf32> to vector<2x1x32xf32>
    %59 = vector.broadcast %57 : vector<2x8x1xf32> to vector<2x8x32xf32>
    %60 = vector.broadcast %58 : vector<2x1x32xf32> to vector<2x8x32xf32>
    %61 = arith.mulf %59, %60 : vector<2x8x32xf32>
    %62 = arith.addf %56, %61 : vector<2x8x32xf32>
    %63 = vector.extract_strided_slice %26 {offsets = [0, 0, 6], sizes = [2, 8, 1], strides = [1, 1, 1]} : vector<2x8x8xf32> to vector<2x8x1xf32>
    %64 = vector.extract_strided_slice %27 {offsets = [0, 6, 0], sizes = [2, 1, 32], strides = [1, 1, 1]} : vector<2x8x32xf32> to vector<2x1x32xf32>
    %65 = vector.broadcast %63 : vector<2x8x1xf32> to vector<2x8x32xf32>
    %66 = vector.broadcast %64 : vector<2x1x32xf32> to vector<2x8x32xf32>
    %67 = arith.mulf %65, %66 : vector<2x8x32xf32>
    %68 = arith.addf %62, %67 : vector<2x8x32xf32>
    %69 = vector.extract_strided_slice %26 {offsets = [0, 0, 7], sizes = [2, 8, 1], strides = [1, 1, 1]} : vector<2x8x8xf32> to vector<2x8x1xf32>
    %70 = vector.extract_strided_slice %27 {offsets = [0, 7, 0], sizes = [2, 1, 32], strides = [1, 1, 1]} : vector<2x8x32xf32> to vector<2x1x32xf32>
    %71 = vector.broadcast %69 : vector<2x8x1xf32> to vector<2x8x32xf32>
    %72 = vector.broadcast %70 : vector<2x1x32xf32> to vector<2x8x32xf32>
    %73 = arith.mulf %71, %72 : vector<2x8x32xf32>
    %74 = arith.addf %68, %73 : vector<2x8x32xf32>
    %75 = vector.shape_cast %74 : vector<2x8x32xf32> to vector<16x32xf32>
    %76 = arith.truncf %75 : vector<16x32xf32> to vector<16x32xbf16>
    %c0_17 = arith.constant 0 : index
    %c0_18 = arith.constant 0 : index
    %77 = vector.load %arg7[%c0_17, %c0_18] : memref<4x32xbf16, #tpu.memory_space<vmem>>, vector<4x32xbf16>
    %78 = tpu.transpose %76, [1, 0] : vector<16x32xbf16> -> vector<32x16xbf16>
    %cst_19 = arith.constant dense<0.000000e+00> : vector<4x16xf32>
    %79 = tpu.matmul %77, %78, %cst_19 {dimension_numbers = #tpu.dot_dimension_numbers<[1], [0], [0], [1], [0, 0, 1, 1], [], []>} : vector<4x32xbf16>, vector<32x16xbf16>, vector<4x16xf32> -> vector<4x16xf32>
    %c0_20 = arith.constant 0 : index
    %c0_21 = arith.constant 0 : index
    %80 = vector.load %arg8[%c0_20, %c0_21] : memref<4x1xf32, #tpu.memory_space<vmem>>, vector<4x1xf32>
    %81 = vector.broadcast %80 : vector<4x1xf32> to vector<4x16xf32>
    %82 = arith.addf %79, %81 : vector<4x16xf32>
    %c0_22 = arith.constant 0 : index
    %c0_23 = arith.constant 0 : index
    %83 = vector.load %arg9[%c0_22, %c0_23] : memref<4x16xf32, #tpu.memory_space<vmem>>, vector<4x16xf32>
    tpu.vector_store %arg9[%c0_22, %c0_23], %82 {strides = array<i32>} : memref<4x16xf32, #tpu.memory_space<vmem>>, vector<4x16xf32>,
    return
  }
  func.func @transform_0(%arg0: i32) -> (i32, i32) {
    %c0_i32 = arith.constant 0 : i32
    %c0_i32_0 = arith.constant 0 : i32
    return %arg0, %c0_i32 : i32, i32
  }
  func.func @transform_1(%arg0: i32) -> (i32, i32, i32) {
    %c0_i32 = arith.constant 0 : i32
    %c0_i32_0 = arith.constant 0 : i32
    %c0_i32_1 = arith.constant 0 : i32
    return %arg0, %c0_i32, %c0_i32_0 : i32, i32, i32
  }
  func.func @transform_2(%arg0: i32) -> (i32, i32) {
    %c0_i32 = arith.constant 0 : i32
    %c0_i32_0 = arith.constant 0 : i32
    %c0_i32_1 = arith.constant 0 : i32
    return %c0_i32, %c0_i32_0 : i32, i32
  }
  func.func @transform_3(%arg0: i32) -> (i32, i32) {
    %c0_i32 = arith.constant 0 : i32
    %c0_i32_0 = arith.constant 0 : i32
    %c0_i32_1 = arith.constant 0 : i32
    return %c0_i32, %c0_i32_0 : i32, i32
  }
  func.func @transform_4(%arg0: i32) -> (i32, i32) {
    %c0_i32 = arith.constant 0 : i32
    %c0_i32_0 = arith.constant 0 : i32
    %c0_i32_1 = arith.constant 0 : i32
    return %c0_i32, %c0_i32_0 : i32, i32
  }
  func.func @transform_5(%arg0: i32) -> (i32, i32) {
    %c0_i32 = arith.constant 0 : i32
    %c0_i32_0 = arith.constant 0 : i32
    %c0_i32_1 = arith.constant 0 : i32
    return %c0_i32, %c0_i32_0 : i32, i32
  }
  func.func @transform_6(%arg0: i32) -> (i32, i32) {
    %c0_i32 = arith.constant 0 : i32
    %c0_i32_0 = arith.constant 0 : i32
    %c0_i32_1 = arith.constant 0 : i32
    return %c0_i32, %c0_i32_0 : i32, i32
  }
  func.func @transform_7(%arg0: i32) -> (i32, i32) {
    %c0_i32 = arith.constant 0 : i32
    %c0_i32_0 = arith.constant 0 : i32
    %c0_i32_1 = arith.constant 0 : i32
    return %c0_i32, %c0_i32_0 : i32, i32
  }
  func.func @transform_8(%arg0: i32) -> (i32, i32) {
    %c0_i32 = arith.constant 0 : i32
    %c0_i32_0 = arith.constant 0 : i32
    return %c0_i32, %arg0 : i32, i32
  }
}

</mosaic_0001>

<bundles_post_ra>
// kernel: tpu_custom_call.1
= control target key start
LH: loop header
LB: loop body
LE: loop exit
PB: predicated region body
PF: predicated region fallthrough
CT: control target
= control target key end

     0   :  { %13 = vsyncpa [#allocation3], 0  ;;  %s795_s0 = inlined_call_operand.hbm [shape: bf16[16,32], index: 0, kind: input, shape index: {}]   ;;  %s796_s1 = inlined_call_operand.hbm [shape: f32[2,8,8], index: 1, kind: input, shape index: {}]   ;;  %s797_s2 = inlined_call_operand.hbm [shape: bf16[32,32], index: 2, kind: input, shape index: {}]   ;;  %s798_s3 = inlined_call_operand.vmem [shape: f32[1,32], index: 3, kind: input, shape index: {}]   ;;  %s799_s4 = inlined_call_operand.vmem [shape: bf16[32,32], index: 4, kind: input, shape index: {}]   ;;  %s800_s5 = inlined_call_operand.vmem [shape: f32[1,32], index: 5, kind: input, shape index: {}]   ;;  %s801_s6 = inlined_call_operand.vmem [shape: bf16[4,32], index: 6, kind: input, shape index: {}]   ;;  %s802_s7 = inlined_call_operand.vmem [shape: f32[4,1], index: 7, kind: input, shape index: {}]   ;;  %s803_s8 = inlined_call_operand.hbm [shape: f32[4,16], index: 8, kind: output, shape index: {}]  }
   0x1   :  { %14 = vsyncpa [#allocation6], 0 }
   0x2   :  { %15 = vsyncpa [#allocation4], 0  ;;  %s655_s27 = smov [#allocation5]   ;;  %s561_s9 = scalar_lea.hbm %s796_s1, 256 }
   0x3   :  { %s33_s28 = sshll.u32 %s655_s27, 4  ;;  %p562_p0 = scmp.ne.s32.totalorder %s796_s1, %s561_s9  ;;  %s34_s28 = int_to_ptr.vmem [resolvable:$true] %s33_s28 }
   0x4   :  { %p565_p1 = scmp.lt.u32.totalorder %s561_s9, %s796_s1 }
   0x6   :  { %p567_p2 = pnand %p565_p1, %p562_p0 }
   0x8   :  { %570 = shalt.err (!%p567_p2)
}
   0x9   :  { %s571_s14 = scalar_lea.vmem %s34_s28, 256  ;;  %p576_p4 = scmp.lt.s32.totalorder %s34_s28, %s34_s28 }
   0xa   :  { %p572_p3 = scmp.ne.s32.totalorder %s34_s28, %s571_s14  ;;  %p577_p5 = scmp.lt.s32.totalorder %s571_s14, %s571_s14 }
   0xc   :  { %p578_p6 = por %p577_p5, %p576_p4 }
   0xe   :  { %p579_p7 = pnand %p578_p6, %p572_p3 }
  0x10   :  { %582 = shalt.err (!%p579_p7)
}
  0x11   :  { %s656_s15 = smov 128   ;;  %s657_s16 = smov 8  }
  0x12   :  { %39 = dma.hbm_to_vmem [thread:$0]  %s796_s1, 256, %s34_s28, [#allocation6], %s656_s15, %s656_s15, %s657_s16  }
  0x13   :  { %s658_s19 = smov [#allocation2]   ;;  %s583_s23 = scalar_lea.hbm %s795_s0, 128 }
  0x14   :  { %s21_s20 = sshll.u32 %s658_s19, 4  ;;  %p584_p8 = scmp.ne.s32.totalorder %s795_s0, %s583_s23  ;;  %s22_s20 = int_to_ptr.vmem [resolvable:$true] %s21_s20 }
  0x15   :  { %p587_p9 = scmp.lt.u32.totalorder %s583_s23, %s795_s0 }
  0x17   :  { %p589_p10 = pnand %p587_p9, %p584_p8 }
  0x19   :  { %592 = shalt.err (!%p589_p10)
}
  0x1a   :  { %s593_s29 = scalar_lea.vmem %s22_s20, 128  ;;  %p598_p12 = scmp.lt.s32.totalorder %s22_s20, %s22_s20 }
  0x1b   :  { %p594_p11 = scmp.ne.s32.totalorder %s22_s20, %s593_s29  ;;  %p599_p13 = scmp.lt.s32.totalorder %s593_s29, %s593_s29 }
  0x1d   :  { %p600_p0 = por %p599_p13, %p598_p12 }
  0x1f   :  { %p601_p1 = pnand %p600_p0, %p594_p11 }
  0x21   :  { %604 = shalt.err (!%p601_p1)
}
  0x22   :  { %s659_s1 = smov 64   ;;  %s660_s28 = smov 4  }
  0x23   :  { %27 = dma.hbm_to_vmem [thread:$0]  %s795_s0, 128, %s22_s20, [#allocation3], %s659_s1, %s659_s1, %s660_s28  }
  0x24   :  { %s661_s10 = smov [#allocation7]   ;;  %s605_s14 = scalar_lea.hbm %s797_s2, 256 }
  0x25   :  { %s45_s11 = sshll.u32 %s661_s10, 4  ;;  %p606_p2 = scmp.ne.s32.totalorder %s797_s2, %s605_s14  ;;  %s46_s11 = int_to_ptr.vmem [resolvable:$true] %s45_s11 }
  0x26   :  { %p609_p3 = scmp.lt.u32.totalorder %s605_s14, %s797_s2 }
  0x28   :  { %p611_p4 = pnand %p609_p3, %p606_p2 }
  0x2a   :  { %614 = shalt.err (!%p611_p4)
}
  0x2b   :  { %s615_s19 = scalar_lea.vmem %s46_s11, 256  ;;  %p620_p6 = scmp.lt.s32.totalorder %s46_s11, %s46_s11 }
  0x2c   :  { %p616_p5 = scmp.ne.s32.totalorder %s46_s11, %s615_s19  ;;  %p621_p7 = scmp.lt.s32.totalorder %s615_s19, %s615_s19 }
  0x2e   :  { %p622_p8 = por %p621_p7, %p620_p6 }
  0x30   :  { %p623_p9 = pnand %p622_p8, %p616_p5 }
  0x32   :  { %626 = shalt.err (!%p623_p9)
}
  0x33   :  { %51 = dma.hbm_to_vmem [thread:$0]  %s797_s2, 256, %s46_s11, [#allocation6], %s659_s1, %s659_s1, %s660_s28  }
  0x34   :  { %649 = dma.done.wait [#allocation3], 128  }
  0x35   :  { %650 = vsyncadd [#allocation3], 4294967168 }
  0x36   :  { %651 = dma.done.wait [#allocation6], 512  }
  0x37   :  { %652 = vsyncadd [#allocation6], 4294966784  ;;  %v662_v0 = vmov 0.0   ;;  %vm663_vm0 = vmmov 0   ;;  %vm221_vm1 = vcmask 64512   ;;  %v219_v1 = vld [vmem:[#allocation5] sm:$0xff]  ;;  %v254_v54 = vlaneseq }
  0x38   :  { %494 = vmatprep.subr.bf16.mxu0 %v662_v0  ;;  %498 = vmatprep.mubr.msk.bf16.mxu0 %vm663_vm0, %v662_v0  ;;  %v222_v2 = vsel %vm221_vm1, %v219_v1, -inf  ;;  %v548_v3 = vld [vmem:[#allocation7] sm:$0xff]   ;;  %v220_v4 = vld [vmem:[#allocation5 + $0x8] sm:$0xff]  ;;  %v549_v6 = vld [vmem:[#allocation7 + $0x8] sm:$0xff]   ;;  %vm102_vm2 = vcmask 261120   ;;  %v664_v20 = vmov 0  }
  0x39   :  { %502 = vmatprep.subr.bf16.mxu1 %v662_v0  ;;  %506 = vmatprep.mubr.msk.bf16.mxu1 %vm663_vm0, %v662_v0  ;;  %v225_v5 = vsel %vm221_vm1, %v220_v4, -inf  ;;  %v550_v7 = vld [vmem:[#allocation2] sm:$0xff]   ;;  %v552_v9 = vld [vmem:[%s799_s4 + $0x8] sm:$0xff]   ;;  %v665_v37 = vmov 4   ;;  %v666_v38 = vmov 1   ;;  %v667_v39 = vmov 6  }
  0x3a   :  { %223 = vmax.xlane.f32.xlu0 %v222_v2  ;;  %495 = vmatpush3.bf16.msra.mxu0 %v548_v3  ;;  %v551_v8 = vld [vmem:[%s799_s4] sm:$0xff]   ;;  %v668_v40 = vmov 7   ;;  %v669_v41 = vmov 2   ;;  %v670_v42 = vmov 3   ;;  %v671_v43 = vmov 5   ;;  %s672_s29 = smov [#allocation8]  }
  0x3b   :  { %496 = vmatprep.subr.bf16.mxu0 %v662_v0  ;;  %503 = vmatpush3.bf16.msra.mxu1 %v551_v8  ;;  %v476_v21 = vld [vmem:[%s798_s3] ss:$0 sm:$0xff]  ;;  %v255_v59 = vshrl.u32 %v254_v54, 7  ;;  %s466_s1 = sshll.u32 %s672_s29, 4  ;;  %vm458_vm3 = vcmask 125952   ;;  %s467_s1 = int_to_ptr.vmem [resolvable:$true] %s466_s1 }
  0x3c   :  { %504 = vmatprep.subr.bf16.mxu1 %v662_v0  ;;  %534 = vset.pattern.permute.xlu0 %v664_v20  ;;  %v406_v44 = vld [vmem:[%s802_s7] sm:$0xf]  ;;  %s627_s28 = scalar_lea.vmem %s467_s1, 64  ;;  %p632_p11 = scmp.lt.s32.totalorder %s467_s1, %s467_s1 }
  0x3d   :  { %535 = vset.pattern.permute.xlu1 %v664_v20  ;;  %v481_v55 = vld [vmem:[%s800_s5] ss:$0 sm:$0xff]  ;;  %v274_v62 = vsub.s32 1, %v255_v59  ;;  %v294_v2 = vsub.s32 2, %v255_v59  ;;  %p628_p10 = scmp.ne.s32.totalorder %s467_s1, %s627_s28  ;;  %p633_p12 = scmp.lt.s32.totalorder %s627_s28, %s627_s28 }
  0x3e   :  { %226 = vmax.xlane.f32.xlu0 %v225_v5  ;;  %497 = vmatpush3.bf16.msra.mxu0 %v549_v6 }
  0x3f   :  { %510 = vmatprep.subr.bf16.mxu0 %v662_v0  ;;  %505 = vmatpush3.bf16.msra.mxu1 %v552_v9  ;;  %p634_p13 = por %p633_p12, %p632_p11 }
  0x41   :  { %499 = vmatmul.mubr.msk.bf16.vlgmr.msra.gmra.mrb[0].mxu0 %vm102_vm2, %v550_v7  ;;  %v314_v7 = vsub.s32 3, %v255_v59  ;;  %p635_p0 = pnand %p634_p13, %p628_p10 }
  0x42   :  { %512 = vmatprep.mubr.msk.bf16.mxu0 %vm663_vm0, %v662_v0  ;;  %v256_v0 = vsub.s32 0, %v255_v59 }
  0xc7   :  { %v224_v10 = vpop.xlane.xlu0 %223 }
  0xc8   :  { %v228_v11 = vsub.f32 %v219_v1, %v224_v10 }
  0xca   :  { %v230_v12 = vmul.f32 1.442695, %v228_v11 }
  0xcb   :  { %v227_v13 = vpop.xlane.xlu0 %226 }
  0xcc   :  { %553 = vpow2.f32 %v230_v12  ;;  %v229_v14 = vsub.f32 %v220_v4, %v227_v13  ;;  %v334_v13 = vsub.s32 4, %v255_v59 }
  0xce   :  { %v232_v15 = vmul.f32 1.442695, %v229_v14 }
  0xd0   :  { %555 = vpow2.f32 %v232_v15 }
  0xd6   :  { %v554_v16 = vpop.eup %553 }
  0xd7   :  { %v234_v17 = vsel %vm221_vm1, %v554_v16, 0.0 }
  0xd8   :  { %235 = vadd.xlane.f32.xlu1 %v234_v17 }
  0xda   :  { %v556_v18 = vpop.eup %555 }
  0xdb   :  { %v237_v19 = vsel %vm221_vm1, %v556_v18, 0.0 }
  0xdc   :  { %238 = vadd.xlane.f32.xlu1 %v237_v19 }
 0x114   :  { %v140_v22 = vpop.f32.mrb[0].mxu0 }
 0x115   :  { %v141_v23 = vadd.f32 %v476_v21, %v140_v22  ;;  %v500_v24 = vpop.f32.mrb[1].mxu0 }
 0x116   :  { %v143_v25 = vpop.f32.mrb[2].mxu0 }
 0x117   :  { %v147_v26 = vmax.f32 %v141_v23, 0.0  ;;  %v144_v27 = vadd.f32 %v476_v21, %v143_v25  ;;  %v501_v28 = vpop.f32.mrb[3].mxu0 }
 0x119   :  { %v148_v29 = vmax.f32 %v144_v27, 0.0 }
 0x11b   :  { %v149_v30 = vpack.c.bf16 %v148_v29, %v147_v26 }
 0x11d   :  { %507 = vmatmul.mubr.msk.bf16.vlgmr.msra.gmra.mrb[0].mxu1 %vm102_vm2, %v149_v30  ;;  %v374_v30 = vsub.s32 6, %v255_v59 }
 0x165   :  { %v236_v31 = vpop.xlane.xlu1 %235 }
 0x166   :  { %557 = vrcp.f32 %v236_v31 }
 0x169   :  { %v239_v32 = vpop.xlane.xlu1 %238 }
 0x16a   :  { %559 = vrcp.f32 %v239_v32 }
 0x170   :  { %v558_v33 = vpop.eup %557 }
 0x171   :  { %v242_v34 = vmul.f32 %v558_v33, %v554_v16 }
 0x173   :  { %246 = vperm.xlu0 %534, %v242_v34  }
 0x174   :  { %v560_v35 = vpop.eup %559 }
 0x175   :  { %v243_v36 = vmul.f32 %v560_v35, %v556_v18 }
 0x177   :  { %540 = vset.pattern.permute.xlu0 %v665_v37  ;;  %251 = vperm.xlu1 %535, %v243_v36  }
 0x178   :  { %329 = vperm.xlu0 %540, %v243_v36  }
 0x17b   :  { %536 = vset.pattern.permute.xlu1 %v666_v38  ;;  %v394_v38 = vsub.s32 7, %v255_v59 }
 0x17c   :  { %542 = vset.pattern.permute.xlu0 %v667_v39  ;;  %265 = vperm.xlu1 %536, %v242_v34  }
 0x17d   :  { %365 = vperm.xlu0 %542, %v242_v34  }
 0x180   :  { %269 = vperm.xlu1 %536, %v243_v36  }
 0x181   :  { %545 = vset.pattern.permute.xlu0 %v668_v40 }
 0x182   :  { %389 = vperm.xlu0 %545, %v243_v36  }
 0x184   :  { %537 = vset.pattern.permute.xlu1 %v669_v41 }
 0x185   :  { %285 = vperm.xlu1 %537, %v242_v34  }
 0x186   :  { %547 = vset.pattern.permute.xlu0 %v664_v20 }
 0x189   :  { %289 = vperm.xlu1 %537, %v243_v36  }
 0x18d   :  { %538 = vset.pattern.permute.xlu1 %v670_v42 }
 0x18e   :  { %305 = vperm.xlu1 %538, %v242_v34  }
 0x192   :  { %309 = vperm.xlu1 %538, %v243_v36  }
 0x196   :  { %539 = vset.pattern.permute.xlu1 %v665_v37 }
 0x197   :  { %325 = vperm.xlu1 %539, %v242_v34  }
 0x19b   :  { %541 = vset.pattern.permute.xlu1 %v671_v43 }
 0x19c   :  { %345 = vperm.xlu1 %541, %v242_v34  }
 0x1a0   :  { %349 = vperm.xlu1 %541, %v243_v36  }
 0x1a4   :  { %543 = vset.pattern.permute.xlu1 %v667_v39 }
 0x1a5   :  { %369 = vperm.xlu1 %543, %v243_v36  }
 0x1a9   :  { %544 = vset.pattern.permute.xlu1 %v668_v40 }
 0x1aa   :  { %385 = vperm.xlu1 %544, %v242_v34  }
 0x1ae   :  { %546 = vset.pattern.permute.xlu1 %v664_v20  ;;  %v354_v20 = vsub.s32 5, %v255_v59 }
 0x1af   :  { %409 = vperm.xlu1 %546, %v406_v44  }
 0x1f0   :  { %v210_v45 = vpop.f32.mrb[0].mxu1 }
 0x1f1   :  { %v508_v46 = vpop.f32.mrb[1].mxu1  ;;  %v211_v58 = vadd.f32 %v481_v55, %v210_v45 }
 0x1f2   :  { %v213_v47 = vpop.f32.mrb[2].mxu1  ;;  %v247_v3 = vpop.permute.xlu0 %246 }
 0x1f3   :  { %v509_v48 = vpop.f32.mrb[3].mxu1  ;;  %v214_v57 = vadd.f32 %v481_v55, %v213_v47  ;;  %v217_v63 = vmax.f32 %v211_v58, 0.0 }
 0x1f5   :  { %v218_v61 = vmax.f32 %v214_v57, 0.0  ;;  %v275_v5 = vrot.slane %v217_v63, %v274_v62  ;;  %v257_v9 = vrot.slane %v217_v63, %v256_v0  ;;  %v295_v11 = vrot.slane %v217_v63, %v294_v2 }
 0x1f6   :  { %v252_v49 = vpop.permute.xlu1 %251  ;;  %v315_v17 = vrot.slane %v217_v63, %v314_v7  ;;  %v335_v19 = vrot.slane %v217_v63, %v334_v13  ;;  %v355_v31 = vrot.slane %v217_v63, %v354_v20  ;;  %v375_v44 = vrot.slane %v217_v63, %v374_v30 }
 0x1f7   :  { %v279_v1 = vrot.slane %v218_v61, %v274_v62  ;;  %v261_v4 = vrot.slane %v218_v61, %v256_v0  ;;  %v299_v6 = vrot.slane %v218_v61, %v294_v2  ;;  %v319_v12 = vrot.slane %v218_v61, %v314_v7  ;;  %v330_v18 = vpop.permute.xlu0 %329 }
 0x1f8   :  { %v262_v22 = vmul.f32 %v257_v9, %v247_v3  ;;  %v339_v26 = vrot.slane %v218_v61, %v334_v13  ;;  %v359_v36 = vrot.slane %v218_v61, %v354_v20  ;;  %v379_v43 = vrot.slane %v218_v61, %v374_v30 }
 0x1f9   :  { %v263_v14 = vmul.f32 %v261_v4, %v252_v49  ;;  %v399_v49 = vrot.slane %v218_v61, %v394_v38  ;;  %v395_v55 = vrot.slane %v217_v63, %v394_v38  ;;  %v405_v61 = vld [vmem:[%s801_s6] sm:$0x3] }
 0x1fa   :  { %v341_v39 = vmul.f32 %v339_v26, %v330_v18 }
 0x1fb   :  { %v266_v50 = vpop.permute.xlu1 %265 }
 0x1fc   :  { %v280_v15 = vmul.f32 %v275_v5, %v266_v50  ;;  %v366_v37 = vpop.permute.xlu0 %365 }
 0x1fe   :  { %v282_v27 = vadd.f32 %v280_v15, %v262_v22 }
 0x1ff   :  { %v270_v51 = vpop.permute.xlu1 %269 }
 0x200   :  { %v281_v10 = vmul.f32 %v279_v1, %v270_v51 }
 0x202   :  { %v283_v23 = vadd.f32 %v281_v10, %v263_v14 }
 0x204   :  { %v286_v52 = vpop.permute.xlu1 %285 }
 0x205   :  { %v300_v24 = vmul.f32 %v295_v11, %v286_v52  ;;  %v390_v52 = vpop.permute.xlu0 %389 }
 0x206   :  { %v401_v57 = vmul.f32 %v399_v49, %v390_v52 }
 0x207   :  { %v302_v33 = vadd.f32 %v300_v24, %v282_v27 }
 0x208   :  { %v290_v53 = vpop.permute.xlu1 %289 }
 0x209   :  { %v301_v16 = vmul.f32 %v299_v6, %v290_v53  ;;  %v380_v53 = vmul.f32 %v375_v44, %v366_v37 }
 0x20b   :  { %v303_v28 = vadd.f32 %v301_v16, %v283_v23 }
 0x20d   :  { %v306_v56 = vpop.permute.xlu1 %305 }
 0x20e   :  { %v320_v29 = vmul.f32 %v315_v17, %v306_v56 }
 0x210   :  { %v322_v40 = vadd.f32 %v320_v29, %v302_v33 }
 0x211   :  { %v310_v60 = vpop.permute.xlu1 %309 }
 0x212   :  { %v321_v25 = vmul.f32 %v319_v12, %v310_v60 }
 0x214   :  { %v323_v34 = vadd.f32 %v321_v25, %v303_v28 }
 0x216   :  { %v326_v8 = vpop.permute.xlu1 %325  ;;  %v343_v46 = vadd.f32 %v341_v39, %v323_v34 }
 0x217   :  { %v340_v35 = vmul.f32 %v335_v19, %v326_v8 }
 0x219   :  { %v342_v45 = vadd.f32 %v340_v35, %v322_v40 }
 0x21b   :  { %v346_v21 = vpop.permute.xlu1 %345 }
 0x21c   :  { %v360_v41 = vmul.f32 %v355_v31, %v346_v21 }
 0x21e   :  { %v362_v50 = vadd.f32 %v360_v41, %v342_v45 }
 0x21f   :  { %v350_v32 = vpop.permute.xlu1 %349 }
 0x220   :  { %v361_v42 = vmul.f32 %v359_v36, %v350_v32  ;;  %v382_v58 = vadd.f32 %v380_v53, %v362_v50 }
 0x222   :  { %v363_v51 = vadd.f32 %v361_v42, %v343_v46 }
 0x224   :  { %v370_v47 = vpop.permute.xlu1 %369 }
 0x225   :  { %v381_v48 = vmul.f32 %v379_v43, %v370_v47 }
 0x227   :  { %v383_v54 = vadd.f32 %v381_v48, %v363_v51 }
 0x229   :  { %v386_v56 = vpop.permute.xlu1 %385  ;;  %v403_v60 = vadd.f32 %v401_v57, %v383_v54 }
 0x22a   :  { %v400_v59 = vmul.f32 %v395_v55, %v386_v56 }
 0x22c   :  { %v402_v62 = vadd.f32 %v400_v59, %v382_v58 }
 0x22e   :  { %v404_v0 = vpack.c.bf16 %v403_v60, %v402_v62  ;;  %v410_v2 = vpop.permute.xlu1 %409 }
 0x230   :  { %v416_v1 = vsel %vm102_vm2, %v404_v0, 0 }
 0x231   :  { %511 = vmatpush3.bf16.xpose.msra.mxu0 %v416_v1 }
 0x238   :  { %513 = vmatmul.mubr.msk.bf16.vlgmr.msra.gmra.mrb[4].mxu0 %vm102_vm2, %v405_v61 }
 0x30b   :  { %v452_v63 = vpop.f32.mrb[4].mxu0 }
 0x30c   :  { %v453_v3 = vadd.f32 %v452_v63, %v410_v2  ;;  %v514_v4 = vpop.f32.mrb[5].mxu0 }
 0x30d   :  { %v455_v5 = vpop.f32.mrb[6].mxu0 }
 0x30e   :  { %v515_v6 = vpop.f32.mrb[7].mxu0  ;;  %459 = vst.msk [vmem:[#allocation8] sm:$0xf] %vm458_vm3, %v453_v3 }
 0x30f   :  { %638 = shalt.err (!%p635_p0)
}
 0x310   :  { %s639_s9 = scalar_lea.hbm %s803_s8, 64 }
 0x311   :  { %p640_p1 = scmp.ne.s32.totalorder %s803_s8, %s639_s9  ;;  %p643_p2 = scmp.lt.u32.totalorder %s639_s9, %s803_s8 }
 0x313   :  { %p645_p3 = pnand %p643_p2, %p640_p1 }
 0x315   :  { %648 = shalt.err (!%p645_p3)
}
 0x316   :  { %469 = dma.vmem_to_hbm [thread:$0]  %s467_s1, 64, %s803_s8, [#allocation4]  }
 0x317   :  { %653 = dma.done.wait [#allocation4], 64  }
 0x318   :  { %654 = vsyncadd [#allocation4], 4294967232 }
 0x319   :  { %473 = vsyncpa [#allocation3], 1 }
 0x31a   :  { %474 = vsyncpa [#allocation6], 1 }
 0x31b   :  { %475 = vsyncpa [#allocation4], 1 }

</bundles_post_ra>
